<compile_context>
chip_gen: v6e
topology: v6e:2x2x1
jax: 0.10.0
libtpu: 0.0.40
codegen_flags: <defaults>
</compile_context>

<pallas_src>
import functools

import jax
import jax.numpy as jnp
from jax import lax
from jax.experimental import pallas as pl
from jax.experimental.pallas import tpu as pltpu


def _round_up(a: int, m: int) -> int:
    return ((a + m - 1) // m) * m


def _linear_kernel_single_k(x_ref, w_ref, b_ref, o_ref, *, operand_dtype):
    """Full K in one block: y_tile = x_tile @ w_tile + b_tile (no accumulation)."""
    xv = x_ref[...]
    wv = w_ref[...]
    if operand_dtype is not None:
        # bf16 operands -> full MXU throughput on v6e/v7x; accumulate in f32.
        xv = xv.astype(operand_dtype)
        wv = wv.astype(operand_dtype)
        acc = jnp.dot(xv, wv, preferred_element_type=jnp.float32)
    else:
        acc = jnp.dot(xv, wv, preferred_element_type=jnp.float32,
                      precision=lax.Precision.HIGHEST)
    o_ref[...] = (acc + b_ref[...]).astype(o_ref.dtype)


def _linear_kernel_multi_k(x_ref, w_ref, b_ref, o_ref, *, operand_dtype):
    """K-tiled: accumulate directly into the resident f32 output block."""
    k = pl.program_id(2)

    xv = x_ref[...]
    wv = w_ref[...]
    if operand_dtype is not None:
        xv = xv.astype(operand_dtype)
        wv = wv.astype(operand_dtype)
        partial = jnp.dot(xv, wv, preferred_element_type=jnp.float32)
    else:
        partial = jnp.dot(xv, wv, preferred_element_type=jnp.float32,
                          precision=lax.Precision.HIGHEST)

    @pl.when(k == 0)
    def _():
        # Bias added exactly once, fused with the first partial product.
        o_ref[...] = (partial + b_ref[...]).astype(o_ref.dtype)

    @pl.when(k > 0)
    def _():
        o_ref[...] = o_ref[...] + partial.astype(o_ref.dtype)


def fully_connected(x, w, b, *, tm=512, tn=512, tk=1024, operand_dtype=None):
    """y = x @ w + b as a tiled, pipelined Pallas TPU kernel.

    x: (B, D_in), w: (D_in, D_out), b: (1, D_out). Returns (B, D_out) float32.
    operand_dtype: None for exact f32 matmul, jnp.bfloat16 for v6e/v7x MXU speed.
    """
    B, D_in = x.shape
    assert w.shape[0] == D_in, "weight must be (D_in, D_out)"
    D_out = w.shape[1]
    assert b.shape == (1, D_out)

    # ---- Block-size selection (lane-dense; full-extent blocks avoid padding). ----
    bm = B if B <= tm else tm                 # tm is a multiple of 8 when tiled
    bn = D_out if D_out <= tn else tn         # tn is a multiple of 128 when tiled
    bk = D_in if D_in <= tk else tk           # tk is a multiple of 128 when tiled

    # v7x heuristic: with only one (i, j) output tile, the second TensorCore
    # idles. If N is big enough and stays 128-aligned, split it into two tiles.
    if B <= tm and D_out <= tn and D_out >= 256 and D_out % 256 == 0:
        bn = D_out // 2

    Mp = _round_up(B, bm)
    Kp = _round_up(D_in, bk)
    Np = _round_up(D_out, bn)

    # Pad only when a dim is larger than one tile AND not tile-aligned.
    xp = x if (Mp == B and Kp == D_in) else jnp.pad(
        x, ((0, Mp - B), (0, Kp - D_in)))
    wp = w if (Kp == D_in and Np == D_out) else jnp.pad(
        w, ((0, Kp - D_in), (0, Np - D_out)))
    bp = b if Np == D_out else jnp.pad(b, ((0, 0), (0, Np - D_out)))

    grid_m, grid_n, grid_k = Mp // bm, Np // bn, Kp // bk

    # Scheduler hint: matmul flops + f32 bytes moved.
    cost = pl.CostEstimate(
        flops=2 * Mp * Np * Kp,
        bytes_accessed=4 * (Mp * Kp + Kp * Np + Mp * Np + Np),
        transcendentals=0,
    )

    # Explicit scoped-VMEM budget: double-buffered x/w/out blocks + bias,
    # with headroom.  Matters on v5e (16 MiB default scoped limit).
    block_bytes = 4 * (2 * (bm * bk + bk * bn + bm * bn) + 2 * bn)
    vmem_limit = int(min(max(block_bytes + (8 << 20), 32 << 20), 96 << 20))

    if grid_k == 1:
        # ---- Fast path: whole K in one block, no accumulation, 2-D grid. ----
        kernel = functools.partial(_linear_kernel_single_k,
                                   operand_dtype=operand_dtype)
        grid_spec = pltpu.PrefetchScalarGridSpec(
            num_scalar_prefetch=0,
            grid=(grid_m, grid_n),
            in_specs=[
                pl.BlockSpec((bm, bk), lambda i, j: (i, 0)),
                pl.BlockSpec((bk, bn), lambda i, j: (0, j)),
                pl.BlockSpec((1, bn), lambda i, j: (0, j)),
            ],
            out_specs=pl.BlockSpec((bm, bn), lambda i, j: (i, j)),
        )
        dim_sem = ("parallel", "parallel")
    else:
        # ---- General path: K-tiled reduction, output resident across k. ----
        kernel = functools.partial(_linear_kernel_multi_k,
                                   operand_dtype=operand_dtype)
        grid_spec = pltpu.PrefetchScalarGridSpec(
            num_scalar_prefetch=0,
            grid=(grid_m, grid_n, grid_k),
            in_specs=[
                pl.BlockSpec((bm, bk), lambda i, j, k: (i, k)),
                pl.BlockSpec((bk, bn), lambda i, j, k: (k, j)),
                pl.BlockSpec((1, bn), lambda i, j, k: (0, j)),
            ],
            out_specs=pl.BlockSpec((bm, bn), lambda i, j, k: (i, j)),
        )
        dim_sem = ("parallel", "parallel", "arbitrary")

    out = pl.pallas_call(
        kernel,
        out_shape=jax.ShapeDtypeStruct((Mp, Np), jnp.float32),
        grid_spec=grid_spec,
        compiler_params=pltpu.CompilerParams(
            dimension_semantics=dim_sem,
            vmem_limit_bytes=vmem_limit,
        ),
        cost_estimate=cost,
    )(xp, wp, bp)

    if Mp != B or Np != D_out:
        out = out[:B, :D_out]
    return out


if __name__ == "__main__":
    key = jax.random.PRNGKey(0)
    k_x, k_w, k_b = jax.random.split(key, 3)

    # --- Test 1: module-sized shapes (batch=8, input_dim=32, output_dim=16). ---
    B, D_in, D_out = 8, 32, 16
    x = jax.random.normal(k_x, (B, D_in), dtype=jnp.float32)
    bound = 1.0 / (D_in ** 0.5)  # PyTorch nn.Linear-style uniform init bound.
    w_pt = jax.random.uniform(k_w, (D_out, D_in), minval=-bound, maxval=bound,
                              dtype=jnp.float32)      # PyTorch layout (out, in)
    b = jax.random.uniform(k_b, (1, D_out), minval=-bound, maxval=bound,
                           dtype=jnp.float32)
    w = w_pt.T                                        # kernel layout (in, out)

    y = fully_connected(x, w, b)
    jax.block_until_ready(y)
    y_ref = x @ w + b
    assert y.shape == (B, D_out)
    assert jnp.allclose(y, y_ref, atol=1e-5, rtol=1e-5)

    # --- Test 2: multi-tile / unaligned-edge path (small tiles forced). ---
    B2, D_in2, D_out2 = 24, 384, 320
    k_x2, k_w2 = jax.random.split(k_x)
    x2 = jax.random.normal(k_x2, (B2, D_in2), dtype=jnp.float32)
    w2 = jax.random.normal(k_w2, (D_in2, D_out2), dtype=jnp.float32) * 0.05
    b2 = jax.random.normal(k_b, (1, D_out2), dtype=jnp.float32) * 0.1
    y2 = fully_connected(x2, w2, b2, tm=16, tn=128, tk=128)
    jax.block_until_ready(y2)
    y2_ref = x2 @ w2 + b2
    assert y2.shape == (B2, D_out2)
    assert jnp.allclose(y2, y2_ref, atol=5e-3, rtol=5e-3)

    # --- Test 3: bf16-operand fast path (v6e/v7x MXU), looser tolerance. ---
    y3 = fully_connected(x2, w2, b2, tm=16, tn=128, tk=128,
                         operand_dtype=jnp.bfloat16)
    jax.block_until_ready(y3)
    assert jnp.allclose(y3, y2_ref, atol=5e-2, rtol=5e-2)

    print("KERNEL_OK")
</pallas_src>

<mosaic_0001>
module attributes {stable_mosaic.version = 11 : i64} {
  func.func @_linear_kernel_single_k(%arg0: i32, %arg1: i32, %arg2: memref<8x32xf32, #tpu.memory_space<vmem>>, %arg3: memref<32x16xf32, #tpu.memory_space<vmem>>, %arg4: memref<1x16xf32, #tpu.memory_space<vmem>>, %arg5: memref<8x16xf32, #tpu.memory_space<vmem>>) attributes {dimension_semantics = [#tpu.dimension_semantics<parallel>, #tpu.dimension_semantics<parallel>], iteration_bounds = array<i64: 1, 1>, scalar_prefetch = 0 : i64, scratch_operands = 0 : i64, tpu.core_type = #tpu.core_type<tc>, window_params = [{transform_indices = @transform_0, window_bounds = array<i64: 8, 32>}, {transform_indices = @transform_1, window_bounds = array<i64: 32, 16>}, {transform_indices = @transform_2, window_bounds = array<i64: 1, 16>}, {transform_indices = @transform_3, window_bounds = array<i64: 8, 16>}]} {
    %c0 = arith.constant 0 : index
    %c0_0 = arith.constant 0 : index
    %0 = vector.load %arg2[%c0, %c0_0] : memref<8x32xf32, #tpu.memory_space<vmem>>, vector<8x32xf32>
    %c0_1 = arith.constant 0 : index
    %c0_2 = arith.constant 0 : index
    %1 = vector.load %arg3[%c0_1, %c0_2] : memref<32x16xf32, #tpu.memory_space<vmem>>, vector<32x16xf32>
    %cst = arith.constant dense<0.000000e+00> : vector<8x16xf32>
    %2 = tpu.matmul %0, %1, %cst {dimension_numbers = #tpu.dot_dimension_numbers<[1], [0], [0], [1], [0, 0, 1, 1], [], []>, precision = #tpu.contract_precision<fp32>} : vector<8x32xf32>, vector<32x16xf32>, vector<8x16xf32> -> vector<8x16xf32>
    %c0_3 = arith.constant 0 : index
    %c0_4 = arith.constant 0 : index
    %3 = vector.load %arg4[%c0_3, %c0_4] : memref<1x16xf32, #tpu.memory_space<vmem>>, vector<1x16xf32>
    %4 = vector.broadcast %3 : vector<1x16xf32> to vector<8x16xf32>
    %5 = arith.addf %2, %4 : vector<8x16xf32>
    %c0_5 = arith.constant 0 : index
    %c0_6 = arith.constant 0 : index
    %6 = vector.load %arg5[%c0_5, %c0_6] : memref<8x16xf32, #tpu.memory_space<vmem>>, vector<8x16xf32>
    tpu.vector_store %arg5[%c0_5, %c0_6], %5 {strides = array<i32>} : memref<8x16xf32, #tpu.memory_space<vmem>>, vector<8x16xf32>,
    return
  }
  func.func @transform_0(%arg0: i32, %arg1: i32) -> (i32, i32) {
    %c0_i32 = arith.constant 0 : i32
    %c0_i32_0 = arith.constant 0 : i32
    return %arg0, %c0_i32 : i32, i32
  }
  func.func @transform_1(%arg0: i32, %arg1: i32) -> (i32, i32) {
    %c0_i32 = arith.constant 0 : i32
    %c0_i32_0 = arith.constant 0 : i32
    return %c0_i32, %arg1 : i32, i32
  }
  func.func @transform_2(%arg0: i32, %arg1: i32) -> (i32, i32) {
    %c0_i32 = arith.constant 0 : i32
    %c0_i32_0 = arith.constant 0 : i32
    return %c0_i32, %arg1 : i32, i32
  }
  func.func @transform_3(%arg0: i32, %arg1: i32) -> (i32, i32) {
    %c0_i32 = arith.constant 0 : i32
    return %arg0, %arg1 : i32, i32
  }
}

</mosaic_0001>

<bundles_post_ra>
// kernel: tpu_custom_call.1
= control target key start
LH: loop header
LB: loop body
LE: loop exit
PB: predicated region body
PF: predicated region fallthrough
CT: control target
= control target key end

     0   :  { %vm27_vm0 = vcmask 261120   ;;  %v654_v3 = vmov 0.0   ;;  %vm655_vm1 = vmmov 0   ;;  %s764_s0 = inlined_call_operand.vmem [shape: f32[8,32], index: 0, kind: input, shape index: {}]   ;;  %s765_s1 = inlined_call_operand.vmem [shape: f32[32,16], index: 1, kind: input, shape index: {}]   ;;  %s766_s2 = inlined_call_operand.vmem [shape: f32[1,16], index: 2, kind: input, shape index: {}]   ;;  %s767_s3 = inlined_call_operand.hbm [shape: f32[8,16], index: 3, kind: output, shape index: {}]  }
   0x1   :  { %v19_v0 = vld [vmem:[%s765_s1 + $0x18] sm:$0xff]  ;;  %v18_v1 = vld [vmem:[%s765_s1 + $0x10] sm:$0xff]  ;;  %v17_v2 = vld [vmem:[%s765_s1 + $0x8] sm:$0xff]  ;;  %563 = vmatprep.subr.mxu0 %v654_v3  ;;  %574 = vmatprep.subr.mxu1 %v654_v3 }
   0x2   :  { %v687_v4 = vand.u32 4294901760, %v19_v0  ;;  %v689_v5 = vand.u32 4294901760, %v18_v1  ;;  %v691_v6 = vand.u32 4294901760, %v17_v2  ;;  %v16_v7 = vld [vmem:[%s765_s1] sm:$0xff]  ;;  %571 = vmatprep.mubr.msk.f32.mxu0 %vm655_vm1, %v654_v3  ;;  %582 = vmatprep.mubr.msk.f32.mxu1 %vm655_vm1, %v654_v3 }
   0x3   :  { %v15_v8 = vld [vmem:[%s764_s0] sm:$0xff]  ;;  %v700_v9 = vand.u32 4294901760, %v16_v7 }
   0x4   :  { %v29_v10 = vsel %vm27_vm0, %v15_v8, 0 }
   0x5   :  { %8 = vsyncpa [#allocation3], 0  ;;  %564 = vmatpush3.msra.mxu0 %v687_v4  ;;  %v136_v11 = vsub.f32 %v19_v0, %v687_v4  ;;  %v708_v12 = vand.u32 4294901760, %v29_v10  ;;  %v143_v13 = vsub.f32 %v18_v1, %v689_v5  ;;  %v150_v14 = vsub.f32 %v17_v2, %v691_v6  ;;  %v532_v35 = vld [vmem:[%s766_s2] ss:$0 sm:$0xff]  ;;  %s656_s22 = smov [#allocation2]  }
   0x6   :  { %565 = vmatprep.subr.mxu0 %v654_v3  ;;  %v157_v15 = vsub.f32 %v16_v7, %v700_v9  ;;  %s524_s23 = sshll.u32 %s656_s22, 4  ;;  %vm516_vm2 = vcmask 130048   ;;  %s525_s23 = int_to_ptr.vmem [resolvable:$true] %s524_s23 }
   0x7   :  { %566 = vmatpush3.msra.mxu0 %v689_v5  ;;  %v137_v16 = vand.u32 4294901760, %v136_v11  ;;  %v101_v17 = vsub.f32 %v29_v10, %v708_v12  ;;  %v144_v18 = vand.u32 4294901760, %v143_v13  ;;  %v151_v19 = vand.u32 4294901760, %v150_v14  ;;  %s632_s2 = scalar_lea.vmem %s525_s23, 128  ;;  %p637_p1 = scmp.lt.s32.totalorder %s525_s23, %s525_s23 }
   0x8   :  { %567 = vmatprep.subr.mxu0 %v654_v3  ;;  %v158_v20 = vand.u32 4294901760, %v157_v15  ;;  %p633_p0 = scmp.ne.s32.totalorder %s525_s23, %s632_s2  ;;  %p638_p2 = scmp.lt.s32.totalorder %s632_s2, %s632_s2 }
   0x9   :  { %568 = vmatpush3.msra.mxu0 %v691_v6  ;;  %v138_v21 = vsub.f32 %v136_v11, %v137_v16  ;;  %v102_v22 = vand.u32 4294901760, %v101_v17  ;;  %v145_v23 = vsub.f32 %v143_v13, %v144_v18  ;;  %v152_v24 = vsub.f32 %v150_v14, %v151_v19 }
   0xa   :  { %569 = vmatprep.subr.mxu0 %v654_v3  ;;  %v159_v28 = vsub.f32 %v157_v15, %v158_v20  ;;  %p639_p3 = por %p638_p2, %p637_p1 }
   0xb   :  { %570 = vmatpush3.msra.mxu0 %v700_v9  ;;  %v139_v25 = vand.u32 4294901760, %v138_v21  ;;  %v103_v26 = vsub.f32 %v101_v17, %v102_v22  ;;  %v146_v27 = vand.u32 4294901760, %v145_v23  ;;  %v153_v30 = vand.u32 4294901760, %v152_v24 }
   0xc   :  { %585 = vmatprep.subr.mxu0 %v654_v3  ;;  %v160_v31 = vand.u32 4294901760, %v159_v28  ;;  %p640_p4 = pnand %p639_p3, %p633_p0 }
   0xd   :  { %575 = vmatpush3.msra.mxu1 %v139_v25  ;;  %v104_v29 = vand.u32 4294901760, %v103_v26 }
   0xe   :  { %576 = vmatprep.subr.mxu1 %v654_v3 }
   0xf   :  { %572 = vmatmul.mubr.f32.vlgmr.msra.gmra.mxu0 %v104_v29  ;;  %577 = vmatpush3.msra.mxu1 %v146_v27 }
  0x10   :  { %586 = vmatpush3.msra.mxu0 %v136_v11  ;;  %578 = vmatprep.subr.mxu1 %v654_v3 }
  0x11   :  { %587 = vmatprep.subr.mxu0 %v654_v3  ;;  %579 = vmatpush3.msra.mxu1 %v153_v30 }
  0x12   :  { %588 = vmatpush3.msra.mxu0 %v143_v13  ;;  %580 = vmatprep.subr.mxu1 %v654_v3 }
  0x13   :  { %589 = vmatprep.subr.mxu0 %v654_v3  ;;  %581 = vmatpush3.msra.mxu1 %v160_v31 }
  0x14   :  { %590 = vmatpush3.msra.mxu0 %v150_v14  ;;  %583 = vmatmul.mubr.f32.vlgmr.msra.gmra.mxu1 %v708_v12 }
  0x15   :  { %591 = vmatprep.subr.mxu0 %v654_v3  ;;  %596 = vmatprep.subr.mxu1 %v654_v3 }
  0x16   :  { %592 = vmatpush3.msra.mxu0 %v157_v15  ;;  %597 = vmatpush3.msra.mxu1 %v687_v4 }
  0x17   :  { %593 = vmatprep.mubr.msk.f32.mxu0 %vm655_vm1, %v654_v3  ;;  %598 = vmatprep.subr.mxu1 %v654_v3 }
  0x18   :  { %607 = vmatprep.subr.mxu0 %v654_v3  ;;  %594 = vmatmul.mubr.f32.vlgmr.msra.gmra.mxu0 %v101_v17 }
  0x19   :  { %599 = vmatpush3.msra.mxu1 %v689_v5  ;;  %608 = vmatpush3.msra.mxu0 %v137_v16 }
  0x1a   :  { %600 = vmatprep.subr.mxu1 %v654_v3  ;;  %609 = vmatprep.subr.mxu0 %v654_v3 }
  0x1b   :  { %601 = vmatpush3.msra.mxu1 %v691_v6  ;;  %610 = vmatpush3.msra.mxu0 %v144_v18 }
  0x1c   :  { %602 = vmatprep.subr.mxu1 %v654_v3  ;;  %611 = vmatprep.subr.mxu0 %v654_v3 }
  0x1d   :  { %603 = vmatpush3.msra.mxu1 %v700_v9  ;;  %604 = vmatprep.mubr.msk.f32.mxu1 %vm655_vm1, %v654_v3 }
  0x1e   :  { %612 = vmatpush3.msra.mxu0 %v151_v19  ;;  %605 = vmatmul.mubr.f32.vlgmr.msra.gmra.mxu1 %v102_v22 }
  0x1f   :  { %613 = vmatprep.subr.mxu0 %v654_v3  ;;  %618 = vmatprep.subr.mxu1 %v654_v3 }
  0x20   :  { %614 = vmatpush3.msra.mxu0 %v158_v20  ;;  %615 = vmatprep.mubr.msk.f32.mxu0 %vm655_vm1, %v654_v3 }
  0x21   :  { %619 = vmatpush3.msra.mxu1 %v687_v4  ;;  %616 = vmatmul.mubr.f32.vlgmr.msra.gmra.mxu0 %v708_v12 }
  0x22   :  { %620 = vmatprep.subr.mxu1 %v654_v3  ;;  %626 = vmatprep.mubr.msk.f32.mxu1 %vm655_vm1, %v654_v3 }
  0x23   :  { %621 = vmatpush3.msra.mxu1 %v689_v5 }
  0x24   :  { %622 = vmatprep.subr.mxu1 %v654_v3 }
  0x25   :  { %623 = vmatpush3.msra.mxu1 %v691_v6 }
  0x26   :  { %624 = vmatprep.subr.mxu1 %v654_v3 }
  0x27   :  { %625 = vmatpush3.msra.mxu1 %v700_v9 }
  0x28   :  { %627 = vmatmul.mubr.f32.vlgmr.msra.gmra.mxu1 %v708_v12 }
  0xcf   :  { %v106_v32 = vpop.f32.mrf.mxu0 }
  0xd0   :  { %v107_v38 = vadd.f32 %v532_v35, %v106_v32 }
  0xd1   :  { %v573_v33 = vpop.f32.mrf.mxu0 }
  0xd4   :  { %v197_v34 = vpop.f32.mrf.mxu1 }
  0xd5   :  { %v198_v40 = vadd.f32 %v197_v34, %v107_v38 }
  0xd6   :  { %v584_v36 = vpop.f32.mrf.mxu1 }
  0xd8   :  { %v277_v37 = vpop.f32.mrf.mxu0 }
  0xd9   :  { %v278_v43 = vadd.f32 %v277_v37, %v198_v40 }
  0xda   :  { %v595_v39 = vpop.f32.mrf.mxu0 }
  0xde   :  { %v354_v41 = vpop.f32.mrf.mxu1 }
  0xdf   :  { %v355_v45 = vadd.f32 %v354_v41, %v278_v43 }
  0xe0   :  { %v606_v42 = vpop.f32.mrf.mxu1 }
  0xe1   :  { %v437_v44 = vpop.f32.mrf.mxu0 }
  0xe2   :  { %v438_v47 = vadd.f32 %v437_v44, %v355_v45 }
  0xe3   :  { %v617_v46 = vpop.f32.mrf.mxu0 }
  0xe8   :  { %v512_v48 = vpop.f32.mrf.mxu1 }
  0xe9   :  { %v513_v49 = vadd.f32 %v512_v48, %v438_v47 }
  0xea   :  { %v628_v50 = vpop.f32.mrf.mxu1 }
  0xeb   :  { %517 = vst.msk [vmem:[#allocation2] sm:$0xff] %vm516_vm2, %v513_v49 }
  0xec   :  { %643 = shalt.err (!%p640_p4)
}
  0xed   :  { %527 = dma.vmem_to_hbm [thread:$0]  %s525_s23, 128, %s767_s3, [#allocation3]  }
  0xee   :  { %652 = dma.done.wait [#allocation3], 128  }
  0xef   :  { %653 = vsyncadd [#allocation3], 4294967168 }
  0xf0   :  { %531 = vsyncpa [#allocation3], 1 }

</bundles_post_ra>
